<compile_context>
chip_gen: v7x
topology: tpu7x:2x2x1
jax: 0.10.0
libtpu: 0.0.40
codegen_flags: <defaults>
</compile_context>

<pallas_src>
import functools

import jax
import jax.numpy as jnp
import numpy as np
from jax import lax
from jax.experimental import pallas as pl
from jax.experimental.pallas import tpu as pltpu

LAYER_NAME_TO_OUTPUT_IND = {'alignment': 0, 'language': 1, 'vision': 2}
NUM_LAYERS = 3

_VMEM_BUDGET_BYTES = 20 * 1024 * 1024   # target working set (2x inputs + f32 temps)
_VMEM_LIMIT_BYTES = 40 * 1024 * 1024    # scoped-VMEM limit handed to Mosaic
_NUM_F32_TEMPS = 6                      # estimate of live (TILE, C_pad) f32 values


def _plan_row_tile(rows, ncls, logit_itemsize):
    """Largest multiple-of-16 row tile whose working set fits the VMEM budget."""
    c_pad = ((max(ncls, 1) + 127) // 128) * 128            # VMEM lane padding
    per_row = (2 * (4 * c_pad * logit_itemsize + 128 * 2)  # 2 bufs: 4 logits + bf16 mask
               + _NUM_F32_TEMPS * c_pad * 4)               # in-kernel f32 temporaries
    tile = max(16, (_VMEM_BUDGET_BYTES // per_row) // 16 * 16)
    rows_pad = ((rows + 15) // 16) * 16
    return min(tile, rows_pad)


def _consistency_kernel(t_ref, s0_ref, s1_ref, s2_ref, m_ref, out_ref, *,
                        total_rows):
    """One (TILE, C) row tile -> per-layer (1, C) partial loss vectors.

    t_ref  : (TILE, C)  teacher (vision) logits tile, native dtype (bf16 OK)
    s*_ref : (TILE, C)  student logits tiles (alignment / language / vision)
    m_ref  : (TILE, 1)  bf16 validity mask (1.0 where token < pt_lengths[b])
    out_ref: (1, L, C)  f32 partials  sum_rows p_masked * (lse_l - s_shift_l)
    """
    tile = t_ref.shape[0]
    row0 = pl.program_id(0) * tile
    row_ids = lax.broadcasted_iota(jnp.int32, (tile, 1), 0) + row0
    in_range = row_ids < total_rows                               # (TILE, 1)

    m_raw = m_ref[...].astype(jnp.float32)
    # Tail blocks past `total_rows` hold stale VMEM (can be NaN/Inf): guard
    # BEFORE any exp/max so 0 * Inf can never reach the accumulators.
    valid = jnp.logical_and(in_range, m_raw > 0.0)                # (TILE, 1)
    mask = jnp.where(valid, m_raw, 0.0)

    t = jnp.where(valid, t_ref[...].astype(jnp.float32), 0.0)     # (TILE, C)
    t_shift = t - jnp.max(t, axis=-1, keepdims=True)
    t_exp = jnp.exp(t_shift)
    denom = jnp.sum(t_exp, axis=-1, keepdims=True)                # (TILE, 1)
    # Length mask folded into the teacher probabilities once for all layers.
    p_masked = t_exp * (mask / denom)                             # (TILE, C)

    # L is small & static -> unrolled over the separate student refs.
    for l, s_ref in enumerate((s0_ref, s1_ref, s2_ref)):
        s = jnp.where(valid, s_ref[...].astype(jnp.float32), 0.0)
        s_shift = s - jnp.max(s, axis=-1, keepdims=True)
        lse = jnp.log(jnp.sum(jnp.exp(s_shift), axis=-1, keepdims=True))
        # -(p_masked * log_softmax(s)).sum() == sum p_masked * (lse - s_shift)
        contrib = p_masked * (lse - s_shift)                      # (TILE, C)
        out_ref[0, l:l + 1, :] = jnp.sum(contrib, axis=0, keepdims=True)


def _per_layer_loss_partials(teacher, s0, s1, s2, mask):
    """teacher/s0/s1/s2: (rows, C) native-dtype logits; mask: (rows, 1) bf16.

    Returns per-tile per-layer partial sums of shape (num_tiles, L, C) f32.
    """
    rows, ncls = teacher.shape
    itemsize = max(jnp.dtype(x.dtype).itemsize for x in (teacher, s0, s1, s2))
    tile = _plan_row_tile(rows, ncls, itemsize)
    num_tiles = pl.cdiv(rows, tile)

    logits_spec = pl.BlockSpec((tile, ncls), lambda i: (i, 0))
    mask_spec = pl.BlockSpec((tile, 1), lambda i: (i, 0))
    kernel = functools.partial(_consistency_kernel, total_rows=rows)

    return pl.pallas_call(
        kernel,
        out_shape=jax.ShapeDtypeStruct((num_tiles, NUM_LAYERS, ncls),
                                       jnp.float32),
        grid=(num_tiles,),
        in_specs=[logits_spec, logits_spec, logits_spec, logits_spec, mask_spec],
        out_specs=pl.BlockSpec((1, NUM_LAYERS, ncls), lambda i: (i, 0, 0)),
        compiler_params=pltpu.CompilerParams(
            dimension_semantics=("parallel",),
            vmem_limit_bytes=_VMEM_LIMIT_BYTES),
    )(teacher, s0, s1, s2, mask)


def consistency_regularization_loss(outputs):
    """JAX/Pallas equivalent of ConsistencyRegularizationLoss.forward (defaults).

    outputs: {'teacher_outputs': [align, lang, vision],
              'student_outputs': [align, lang, vision],
              'loss_weight': scalar}
    each layer output: {'logits': (B,T,C), 'pt_lengths': (B,), 'loss_weight': float}
    """
    teacher_preds = outputs['teacher_outputs'][LAYER_NAME_TO_OUTPUT_IND['vision']]
    teacher_logits = jax.lax.stop_gradient(teacher_preds['logits'])   # stop-grad
    pt_lengths = teacher_preds['pt_lengths']                          # (B,) int32

    B, T, C = teacher_logits.shape
    rows = B * T

    # torch.cat([t[:l] for t, l in zip(x, gt_lengths)]) == masked mean with this
    # mask.  MultiCELosses flattens BOTH labels and student logits with the
    # teacher ('gt') lengths, so teacher pt_lengths is correct for every layer.
    mask = (jnp.arange(T, dtype=jnp.int32)[None, :] < pt_lengths[:, None])
    mask = mask.astype(jnp.bfloat16).reshape(rows, 1)                 # (rows, 1)

    layer_weights = jnp.array(
        [o['loss_weight'] for o in outputs['student_outputs']], jnp.float32)

    # Native-dtype (e.g. bf16) views; the only f32 upcast happens in-kernel.
    s0, s1, s2 = (o['logits'].reshape(rows, C) for o in outputs['student_outputs'])
    partials = _per_layer_loss_partials(
        teacher_logits.reshape(rows, C), s0, s1, s2, mask)            # (nt, L, C)
    loss_sums = jnp.sum(partials, axis=(0, 2))                        # (L,)

    n_valid = jnp.sum(pt_lengths).astype(jnp.float32)
    ce_loss_student_teacher = jnp.sum(layer_weights * (loss_sums / n_valid))
    return outputs['loss_weight'] * ce_loss_student_teacher


def _reference(outputs):
    """Pure-JAX mirror of the PyTorch semantics (for verification)."""
    teacher = outputs['teacher_outputs'][2]
    t_logits = teacher['logits'].astype(jnp.float32)
    lengths = teacher['pt_lengths']
    B, T, C = t_logits.shape
    p = jax.nn.softmax(t_logits, axis=-1)
    m = (jnp.arange(T)[None, :] < lengths[:, None]).astype(jnp.float32)
    total = 0.0
    for o in outputs['student_outputs']:
        log_q = jax.nn.log_softmax(o['logits'].astype(jnp.float32), axis=-1)
        tok = -jnp.sum(p * log_q, axis=-1)                 # (B, T)
        loss = jnp.sum(tok * m) / jnp.sum(lengths)         # flatten-by-length mean
        total = total + o['loss_weight'] * loss
    return outputs['loss_weight'] * total


if __name__ == "__main__":
    key = jax.random.PRNGKey(0)
    B, T, C = 2, 8, 32  # batch, max seq len, charset size
    names = ['alignment', 'language', 'vision']
    layer_w = [1.0, 0.7, 1.3]

    def make_outputs(key):
        outs = []
        for name, w in zip(names, layer_w):
            key, k1 = jax.random.split(key)
            logits = jax.random.normal(k1, (B, T, C), jnp.float32).astype(jnp.bfloat16)
            key, k2 = jax.random.split(key)
            lengths = jax.random.randint(k2, (B,), 1, T + 1, dtype=jnp.int32)
            outs.append({'name': name, 'logits': logits,
                         'pt_lengths': lengths, 'loss_weight': w})
        return outs, key

    teacher_outputs, key = make_outputs(key)
    student_outputs, key = make_outputs(key)
    outputs = {'teacher_outputs': teacher_outputs,
               'student_outputs': student_outputs,
               'loss_weight': 0.5}

    loss = jax.block_until_ready(consistency_regularization_loss(outputs))
    ref = jax.block_until_ready(_reference(outputs))
    np.testing.assert_allclose(np.asarray(loss), np.asarray(ref),
                               rtol=2e-5, atol=1e-6)
    print("KERNEL_OK")
</pallas_src>

<mosaic_0001>
module attributes {stable_mosaic.version = 11 : i64} {
  func.func @_consistency_kernel(%arg0: i32, %arg1: memref<16x32xbf16, #tpu.memory_space<vmem>>, %arg2: memref<16x32xbf16, #tpu.memory_space<vmem>>, %arg3: memref<16x32xbf16, #tpu.memory_space<vmem>>, %arg4: memref<16x32xbf16, #tpu.memory_space<vmem>>, %arg5: memref<16x1xbf16, #tpu.memory_space<vmem>>, %arg6: memref<1x3x32xf32, #tpu.memory_space<vmem>>) attributes {dimension_semantics = [#tpu.dimension_semantics<parallel>], iteration_bounds = array<i64: 1>, scalar_prefetch = 0 : i64, scratch_operands = 0 : i64, tpu.core_type = #tpu.core_type<tc>, window_params = [{transform_indices = @transform_0, window_bounds = array<i64: 16, 32>}, {transform_indices = @transform_1, window_bounds = array<i64: 16, 32>}, {transform_indices = @transform_2, window_bounds = array<i64: 16, 32>}, {transform_indices = @transform_3, window_bounds = array<i64: 16, 32>}, {transform_indices = @transform_4, window_bounds = array<i64: 16, 1>}, {transform_indices = @transform_5, window_bounds = array<i64: 1, 3, 32>}]} {
    %c16_i32 = arith.constant 16 : i32
    %0 = arith.muli %arg0, %c16_i32 : i32
    %1 = tpu.iota {dimensions = array<i32: 0>} : vector<16x1xi32>
    %2 = vector.broadcast %0 : i32 to vector<16x1xi32>
    %3 = arith.addi %1, %2 : vector<16x1xi32>
    %c16_i32_0 = arith.constant 16 : i32
    %4 = vector.broadcast %c16_i32_0 : i32 to vector<16x1xi32>
    %5 = arith.cmpi slt, %3, %4 : vector<16x1xi32>
    %c0 = arith.constant 0 : index
    %c0_1 = arith.constant 0 : index
    %6 = vector.load %arg5[%c0, %c0_1] : memref<16x1xbf16, #tpu.memory_space<vmem>>, vector<16x1xbf16>
    %7 = arith.extf %6 : vector<16x1xbf16> to vector<16x1xf32>
    %cst = arith.constant 0.000000e+00 : f32
    %8 = vector.broadcast %cst : f32 to vector<16x1xf32>
    %9 = arith.cmpf ogt, %7, %8 : vector<16x1xf32>
    %10 = arith.andi %5, %9 : vector<16x1xi1>
    %cst_2 = arith.constant 0.000000e+00 : f32
    %11 = vector.broadcast %cst_2 : f32 to vector<16x1xf32>
    %12 = arith.select %10, %7, %11 : vector<16x1xi1>, vector<16x1xf32>
    %c0_3 = arith.constant 0 : index
    %c0_4 = arith.constant 0 : index
    %13 = vector.load %arg1[%c0_3, %c0_4] : memref<16x32xbf16, #tpu.memory_space<vmem>>, vector<16x32xbf16>
    %14 = arith.extf %13 : vector<16x32xbf16> to vector<16x32xf32>
    %cst_5 = arith.constant 0.000000e+00 : f32
    %15 = vector.shape_cast %10 : vector<16x1xi1> to vector<16x1xi1>
    %16 = vector.broadcast %15 : vector<16x1xi1> to vector<16x32xi1>
    %17 = vector.broadcast %cst_5 : f32 to vector<16x32xf32>
    %18 = arith.select %16, %14, %17 : vector<16x32xi1>, vector<16x32xf32>
    %cst_6 = arith.constant dense<0xFF800000> : vector<16xf32>
    %19 = vector.multi_reduction <maximumf>, %18, %cst_6 [1] : vector<16x32xf32> to vector<16xf32>
    %20 = vector.shape_cast %19 : vector<16xf32> to vector<16x1xf32>
    %21 = vector.broadcast %20 : vector<16x1xf32> to vector<16x32xf32>
    %22 = arith.subf %18, %21 : vector<16x32xf32>
    %23 = math.exp %22 : vector<16x32xf32>
    %cst_7 = arith.constant dense<0.000000e+00> : vector<16xf32>
    %24 = vector.multi_reduction <add>, %23, %cst_7 [1] : vector<16x32xf32> to vector<16xf32>
    %25 = vector.shape_cast %24 : vector<16xf32> to vector<16x1xf32>
    %26 = arith.divf %12, %25 : vector<16x1xf32>
    %27 = vector.broadcast %26 : vector<16x1xf32> to vector<16x32xf32>
    %28 = arith.mulf %23, %27 : vector<16x32xf32>
    %c0_8 = arith.constant 0 : index
    %c0_9 = arith.constant 0 : index
    %29 = vector.load %arg2[%c0_8, %c0_9] : memref<16x32xbf16, #tpu.memory_space<vmem>>, vector<16x32xbf16>
    %30 = arith.extf %29 : vector<16x32xbf16> to vector<16x32xf32>
    %cst_10 = arith.constant 0.000000e+00 : f32
    %31 = vector.shape_cast %10 : vector<16x1xi1> to vector<16x1xi1>
    %32 = vector.broadcast %31 : vector<16x1xi1> to vector<16x32xi1>
    %33 = vector.broadcast %cst_10 : f32 to vector<16x32xf32>
    %34 = arith.select %32, %30, %33 : vector<16x32xi1>, vector<16x32xf32>
    %cst_11 = arith.constant dense<0xFF800000> : vector<16xf32>
    %35 = vector.multi_reduction <maximumf>, %34, %cst_11 [1] : vector<16x32xf32> to vector<16xf32>
    %36 = vector.shape_cast %35 : vector<16xf32> to vector<16x1xf32>
    %37 = vector.broadcast %36 : vector<16x1xf32> to vector<16x32xf32>
    %38 = arith.subf %34, %37 : vector<16x32xf32>
    %39 = math.exp %38 : vector<16x32xf32>
    %cst_12 = arith.constant dense<0.000000e+00> : vector<16xf32>
    %40 = vector.multi_reduction <add>, %39, %cst_12 [1] : vector<16x32xf32> to vector<16xf32>
    %41 = vector.shape_cast %40 : vector<16xf32> to vector<16x1xf32>
    %42 = math.log %41 : vector<16x1xf32>
    %43 = vector.broadcast %42 : vector<16x1xf32> to vector<16x32xf32>
    %44 = arith.subf %43, %38 : vector<16x32xf32>
    %45 = arith.mulf %28, %44 : vector<16x32xf32>
    %cst_13 = arith.constant dense<0.000000e+00> : vector<32xf32>
    %46 = vector.multi_reduction <add>, %45, %cst_13 [0] : vector<16x32xf32> to vector<32xf32>
    %47 = vector.shape_cast %46 : vector<32xf32> to vector<1x32xf32>
    %c0_14 = arith.constant 0 : index
    %c0_15 = arith.constant 0 : index
    %c0_16 = arith.constant 0 : index
    %48 = vector.load %arg6[%c0_14, %c0_15, %c0_16] : memref<1x3x32xf32, #tpu.memory_space<vmem>>, vector<1x1x32xf32>
    %49 = vector.shape_cast %48 : vector<1x1x32xf32> to vector<1x32xf32>
    %50 = vector.shape_cast %47 : vector<1x32xf32> to vector<1x1x32xf32>
    tpu.vector_store %arg6[%c0_14, %c0_15, %c0_16], %50 {strides = array<i32>} : memref<1x3x32xf32, #tpu.memory_space<vmem>>, vector<1x1x32xf32>,
    %c0_17 = arith.constant 0 : index
    %c0_18 = arith.constant 0 : index
    %51 = vector.load %arg3[%c0_17, %c0_18] : memref<16x32xbf16, #tpu.memory_space<vmem>>, vector<16x32xbf16>
    %52 = arith.extf %51 : vector<16x32xbf16> to vector<16x32xf32>
    %cst_19 = arith.constant 0.000000e+00 : f32
    %53 = vector.shape_cast %10 : vector<16x1xi1> to vector<16x1xi1>
    %54 = vector.broadcast %53 : vector<16x1xi1> to vector<16x32xi1>
    %55 = vector.broadcast %cst_19 : f32 to vector<16x32xf32>
    %56 = arith.select %54, %52, %55 : vector<16x32xi1>, vector<16x32xf32>
    %cst_20 = arith.constant dense<0xFF800000> : vector<16xf32>
    %57 = vector.multi_reduction <maximumf>, %56, %cst_20 [1] : vector<16x32xf32> to vector<16xf32>
    %58 = vector.shape_cast %57 : vector<16xf32> to vector<16x1xf32>
    %59 = vector.broadcast %58 : vector<16x1xf32> to vector<16x32xf32>
    %60 = arith.subf %56, %59 : vector<16x32xf32>
    %61 = math.exp %60 : vector<16x32xf32>
    %cst_21 = arith.constant dense<0.000000e+00> : vector<16xf32>
    %62 = vector.multi_reduction <add>, %61, %cst_21 [1] : vector<16x32xf32> to vector<16xf32>
    %63 = vector.shape_cast %62 : vector<16xf32> to vector<16x1xf32>
    %64 = math.log %63 : vector<16x1xf32>
    %65 = vector.broadcast %64 : vector<16x1xf32> to vector<16x32xf32>
    %66 = arith.subf %65, %60 : vector<16x32xf32>
    %67 = arith.mulf %28, %66 : vector<16x32xf32>
    %cst_22 = arith.constant dense<0.000000e+00> : vector<32xf32>
    %68 = vector.multi_reduction <add>, %67, %cst_22 [0] : vector<16x32xf32> to vector<32xf32>
    %69 = vector.shape_cast %68 : vector<32xf32> to vector<1x32xf32>
    %c0_23 = arith.constant 0 : index
    %c1 = arith.constant 1 : index
    %c0_24 = arith.constant 0 : index
    %70 = vector.load %arg6[%c0_23, %c1, %c0_24] : memref<1x3x32xf32, #tpu.memory_space<vmem>>, vector<1x1x32xf32>
    %71 = vector.shape_cast %70 : vector<1x1x32xf32> to vector<1x32xf32>
    %72 = vector.shape_cast %69 : vector<1x32xf32> to vector<1x1x32xf32>
    tpu.vector_store %arg6[%c0_23, %c1, %c0_24], %72 {strides = array<i32>} : memref<1x3x32xf32, #tpu.memory_space<vmem>>, vector<1x1x32xf32>,
    %c0_25 = arith.constant 0 : index
    %c0_26 = arith.constant 0 : index
    %73 = vector.load %arg4[%c0_25, %c0_26] : memref<16x32xbf16, #tpu.memory_space<vmem>>, vector<16x32xbf16>
    %74 = arith.extf %73 : vector<16x32xbf16> to vector<16x32xf32>
    %cst_27 = arith.constant 0.000000e+00 : f32
    %75 = vector.shape_cast %10 : vector<16x1xi1> to vector<16x1xi1>
    %76 = vector.broadcast %75 : vector<16x1xi1> to vector<16x32xi1>
    %77 = vector.broadcast %cst_27 : f32 to vector<16x32xf32>
    %78 = arith.select %76, %74, %77 : vector<16x32xi1>, vector<16x32xf32>
    %cst_28 = arith.constant dense<0xFF800000> : vector<16xf32>
    %79 = vector.multi_reduction <maximumf>, %78, %cst_28 [1] : vector<16x32xf32> to vector<16xf32>
    %80 = vector.shape_cast %79 : vector<16xf32> to vector<16x1xf32>
    %81 = vector.broadcast %80 : vector<16x1xf32> to vector<16x32xf32>
    %82 = arith.subf %78, %81 : vector<16x32xf32>
    %83 = math.exp %82 : vector<16x32xf32>
    %cst_29 = arith.constant dense<0.000000e+00> : vector<16xf32>
    %84 = vector.multi_reduction <add>, %83, %cst_29 [1] : vector<16x32xf32> to vector<16xf32>
    %85 = vector.shape_cast %84 : vector<16xf32> to vector<16x1xf32>
    %86 = math.log %85 : vector<16x1xf32>
    %87 = vector.broadcast %86 : vector<16x1xf32> to vector<16x32xf32>
    %88 = arith.subf %87, %82 : vector<16x32xf32>
    %89 = arith.mulf %28, %88 : vector<16x32xf32>
    %cst_30 = arith.constant dense<0.000000e+00> : vector<32xf32>
    %90 = vector.multi_reduction <add>, %89, %cst_30 [0] : vector<16x32xf32> to vector<32xf32>
    %91 = vector.shape_cast %90 : vector<32xf32> to vector<1x32xf32>
    %c0_31 = arith.constant 0 : index
    %c2 = arith.constant 2 : index
    %c0_32 = arith.constant 0 : index
    %92 = vector.load %arg6[%c0_31, %c2, %c0_32] : memref<1x3x32xf32, #tpu.memory_space<vmem>>, vector<1x1x32xf32>
    %93 = vector.shape_cast %92 : vector<1x1x32xf32> to vector<1x32xf32>
    %94 = vector.shape_cast %91 : vector<1x32xf32> to vector<1x1x32xf32>
    tpu.vector_store %arg6[%c0_31, %c2, %c0_32], %94 {strides = array<i32>} : memref<1x3x32xf32, #tpu.memory_space<vmem>>, vector<1x1x32xf32>,
    return
  }
  func.func @transform_0(%arg0: i32) -> (i32, i32) {
    %c0_i32 = arith.constant 0 : i32
    %c0_i32_0 = arith.constant 0 : i32
    return %arg0, %c0_i32 : i32, i32
  }
  func.func @transform_1(%arg0: i32) -> (i32, i32) {
    %c0_i32 = arith.constant 0 : i32
    %c0_i32_0 = arith.constant 0 : i32
    return %arg0, %c0_i32 : i32, i32
  }
  func.func @transform_2(%arg0: i32) -> (i32, i32) {
    %c0_i32 = arith.constant 0 : i32
    %c0_i32_0 = arith.constant 0 : i32
    return %arg0, %c0_i32 : i32, i32
  }
  func.func @transform_3(%arg0: i32) -> (i32, i32) {
    %c0_i32 = arith.constant 0 : i32
    %c0_i32_0 = arith.constant 0 : i32
    return %arg0, %c0_i32 : i32, i32
  }
  func.func @transform_4(%arg0: i32) -> (i32, i32) {
    %c0_i32 = arith.constant 0 : i32
    %c0_i32_0 = arith.constant 0 : i32
    return %arg0, %c0_i32 : i32, i32
  }
  func.func @transform_5(%arg0: i32) -> (i32, i32, i32) {
    %c0_i32 = arith.constant 0 : i32
    %c0_i32_0 = arith.constant 0 : i32
    %c0_i32_1 = arith.constant 0 : i32
    return %arg0, %c0_i32, %c0_i32_0 : i32, i32, i32
  }
}

</mosaic_0001>

<bundles_post_ra>
// kernel: tpu_custom_call.1
= control target key start
LH: loop header
LB: loop body
LE: loop exit
PB: predicated region body
PF: predicated region fallthrough
CT: control target
= control target key end

     0   :  { %10 = vsyncpa [#allocation3], 0  ;;  %s503_s0 = inlined_call_operand.vmem [shape: bf16[16,32], index: 0, kind: input, shape index: {}]   ;;  %s504_s1 = inlined_call_operand.hbm [shape: bf16[16,32], index: 1, kind: input, shape index: {}]   ;;  %s505_s2 = inlined_call_operand.vmem [shape: bf16[16,32], index: 2, kind: input, shape index: {}]   ;;  %s506_s3 = inlined_call_operand.hbm [shape: bf16[16,32], index: 3, kind: input, shape index: {}]   ;;  %s507_s4 = inlined_call_operand.vmem [shape: bf16[16,1], index: 4, kind: input, shape index: {}]   ;;  %s508_s5 = inlined_call_operand.vmem [shape: f32[1,3,32], index: 5, kind: output, shape index: {}]  }
   0x1   :  { %11 = vsyncpa [#allocation5], 0  ;;  %s358_s18 = smov [#allocation2]   ;;  %s310_s22 = scalar_lea.hbm %s504_s1, 128 }
   0x2   :  { %s19_s19 = sshll.u32 %s358_s18, 4  ;;  %p311_p0 = scmp.ne.s32.totalorder %s504_s1, %s310_s22  ;;  %s20_s19 = int_to_ptr.vmem [resolvable:$true] %s19_s19 }
   0x3   :  { %p314_p1 = scmp.lt.u32.totalorder %s310_s22, %s504_s1 }
   0x5   :  { %p316_p2 = pnand %p314_p1, %p311_p0 }
   0x7   :  { %319 = shalt.err (!%p316_p2)
}
   0x8   :  { %s320_s27 = scalar_lea.vmem %s20_s19, 128  ;;  %p325_p4 = scmp.lt.s32.totalorder %s20_s19, %s20_s19 }
   0x9   :  { %p321_p3 = scmp.ne.s32.totalorder %s20_s19, %s320_s27  ;;  %p326_p5 = scmp.lt.s32.totalorder %s320_s27, %s320_s27 }
   0xb   :  { %p327_p6 = por %p326_p5, %p325_p4 }
   0xd   :  { %p328_p7 = pnand %p327_p6, %p321_p3 }
   0xf   :  { %331 = shalt.err (!%p328_p7)
}
  0x10   :  { %s359_s28 = smov 64   ;;  %s360_s29 = smov 4  }
  0x11   :  { %25 = dma.hbm_to_vmem [thread:$0]  %s504_s1, 128, %s20_s19, [#allocation3], %s359_s28, %s359_s28, %s360_s29  }
  0x12   :  { %s361_s7 = smov [#allocation4]   ;;  %s332_s11 = scalar_lea.hbm %s506_s3, 128 }
  0x13   :  { %s33_s8 = sshll.u32 %s361_s7, 4  ;;  %p333_p8 = scmp.ne.s32.totalorder %s506_s3, %s332_s11  ;;  %s34_s8 = int_to_ptr.vmem [resolvable:$true] %s33_s8 }
  0x14   :  { %p336_p9 = scmp.lt.u32.totalorder %s332_s11, %s506_s3 }
  0x16   :  { %p338_p10 = pnand %p336_p9, %p333_p8 }
  0x18   :  { %341 = shalt.err (!%p338_p10)
}
  0x19   :  { %s342_s16 = scalar_lea.vmem %s34_s8, 128  ;;  %p347_p12 = scmp.lt.s32.totalorder %s34_s8, %s34_s8 }
  0x1a   :  { %p343_p11 = scmp.ne.s32.totalorder %s34_s8, %s342_s16  ;;  %p348_p13 = scmp.lt.s32.totalorder %s342_s16, %s342_s16 }
  0x1c   :  { %p349_p0 = por %p348_p13, %p347_p12 }
  0x1e   :  { %p350_p1 = pnand %p349_p0, %p343_p11 }
  0x20   :  { %353 = shalt.err (!%p350_p1)
}
  0x21   :  { %39 = dma.hbm_to_vmem [thread:$0]  %s506_s3, 128, %s34_s8, [#allocation5], %s359_s28, %s359_s28, %s360_s29  }
  0x22   :  { %354 = dma.done.wait [#allocation3], 128  }
  0x23   :  { %355 = vsyncadd [#allocation3], 4294967168 }
  0x24   :  { %356 = dma.done.wait [#allocation5], 128  }
  0x25   :  { %357 = vsyncadd [#allocation5], 4294967168  ;;  %v362_v0 = vmov 0   ;;  %v252_v1 = vld [vmem:[%s507_s4] sm:$0xff]   ;;  %vm83_vm2 = vcmask 261120   ;;  %v268_v28 = vld [vmem:[#allocation4] sm:$0xff]  }
  0x26   :  { %276 = vset.pattern.permute.xlu0 %v362_v0  ;;  %277 = vset.pattern.permute.xlu1 %v362_v0  ;;  %v253_v2 = vunpack.c.l.bf16 %v252_v1  ;;  %v254_v3 = vunpack.c.h.bf16 %v252_v1  ;;  %v260_v8 = vld [vmem:[#allocation2] sm:$0xff]   ;;  %v269_v31 = vunpack.c.l.bf16 %v268_v28  ;;  %v270_v34 = vunpack.c.h.bf16 %v268_v28 }
  0x27   :  { %v256_v9 = vld [vmem:[%s503_s0] sm:$0xff]   ;;  %v261_v10 = vunpack.c.l.bf16 %v260_v8  ;;  %v262_v19 = vunpack.c.h.bf16 %v260_v8  ;;  %vm159_vm5 = vcmask 253952  }
  0x28   :  { %vm61_vm0 = vcmp.gt.f32.partialorder %v253_v2, 0.0  ;;  %vm62_vm1 = vcmp.gt.f32.partialorder %v254_v3, 0.0  ;;  %v257_v11 = vunpack.c.l.bf16 %v256_v9  ;;  %v258_v15 = vunpack.c.h.bf16 %v256_v9  ;;  %v264_v20 = vld [vmem:[%s505_s2] sm:$0xff]  }
  0x29   :  { %v71_v4 = vsel %vm61_vm0, 1, %v362_v0  ;;  %v420_v5 = vsel %vm61_vm0, %v253_v2, 0.0  ;;  %v422_v6 = vsel %vm62_vm1, %v254_v3, 0.0  ;;  %v72_v7 = vsel %vm62_vm1, 1, %v362_v0 }
  0x2a   :  { %74 = vperm.xlu0 %276, %v71_v4   ;;  %v265_v24 = vunpack.c.l.bf16 %v264_v20  ;;  %v266_v27 = vunpack.c.h.bf16 %v264_v20 }
  0x2e   :  { %77 = vperm.xlu0 %276, %v72_v7  }
  0xa9   :  { %v75_v12 = vpop.permute.xlu0 %74 }
  0xaa   :  { %vm79_vm3 = vcmp.eq.s32.totalorder %v75_v12, 1 }
  0xab   :  { %v122_v13 = vsel %vm79_vm3, %v261_v10, 0.0  ;;  %v81_v14 = vsel %vm79_vm3, %v257_v11, 0.0  ;;  %v165_v26 = vsel %vm79_vm3, %v265_v24, 0.0  ;;  %v207_v33 = vsel %vm79_vm3, %v269_v31, 0.0 }
  0xac   :  { %v124_v16 = vsel %vm83_vm2, %v122_v13, -inf  ;;  %v84_v17 = vsel %vm83_vm2, %v81_v14, -inf  ;;  %v167_v29 = vsel %vm83_vm2, %v165_v26, -inf  ;;  %v209_v35 = vsel %vm83_vm2, %v207_v33, -inf }
  0xad   :  { %125 = vmax.xlane.f32.xlu0 %v124_v16  ;;  %85 = vmax.xlane.f32.xlu1 %v84_v17  ;;  %v78_v18 = vpop.permute.xlu0 %77 }
  0xae   :  { %vm80_vm4 = vcmp.eq.s32.totalorder %v78_v18, 1 }
  0xaf   :  { %v82_v21 = vsel %vm80_vm4, %v258_v15, 0.0  ;;  %v123_v23 = vsel %vm80_vm4, %v262_v19, 0.0  ;;  %v166_v30 = vsel %vm80_vm4, %v266_v27, 0.0  ;;  %v208_v36 = vsel %vm80_vm4, %v270_v34, 0.0 }
  0xb0   :  { %v87_v22 = vsel %vm83_vm2, %v82_v21, -inf  ;;  %v127_v25 = vsel %vm83_vm2, %v123_v23, -inf  ;;  %v170_v32 = vsel %vm83_vm2, %v166_v30, -inf  ;;  %v212_v37 = vsel %vm83_vm2, %v208_v36, -inf }
  0xb1   :  { %88 = vmax.xlane.f32.xlu1 %v87_v22 }
  0xb5   :  { %128 = vmax.xlane.f32.xlu1 %v127_v25 }
  0xb9   :  { %168 = vmax.xlane.f32.xlu1 %v167_v29 }
  0xbd   :  { %171 = vmax.xlane.f32.xlu1 %v170_v32 }
  0xc1   :  { %210 = vmax.xlane.f32.xlu1 %v209_v35 }
  0xc5   :  { %213 = vmax.xlane.f32.xlu1 %v212_v37 }
 0x13a   :  { %v86_v38 = vpop.xlane.xlu1 %85  ;;  %v126_v39 = vpop.xlane.xlu0 %125 }
 0x13b   :  { %v90_v40 = vsub.f32 %v81_v14, %v86_v38  ;;  %v446_v42 = vsub.f32 %v122_v13, %v126_v39 }
 0x13d   :  { %v92_v41 = vmul.f32 1.442695, %v90_v40  ;;  %v132_v45 = vmul.f32 1.442695, %v446_v42 }
 0x13e   :  { %v89_v43 = vpop.xlane.xlu1 %88 }
 0x13f   :  { %278 = vpow2.f32 %v92_v41  ;;  %v91_v44 = vsub.f32 %v82_v21, %v89_v43 }
 0x141   :  { %v94_v46 = vmul.f32 1.442695, %v91_v44 }
 0x142   :  { %v129_v47 = vpop.xlane.xlu1 %128 }
 0x143   :  { %280 = vpow2.f32 %v94_v46  ;;  %v449_v48 = vsub.f32 %v123_v23, %v129_v47 }
 0x144   :  { %282 = vpow2.f32 %v132_v45 }
 0x145   :  { %v134_v49 = vmul.f32 1.442695, %v449_v48 }
 0x146   :  { %v169_v50 = vpop.xlane.xlu1 %168 }
 0x147   :  { %284 = vpow2.f32 %v134_v49  ;;  %v452_v51 = vsub.f32 %v165_v26, %v169_v50 }
 0x149   :  { %v454_v52 = vpop.eup %278  ;;  %v175_v53 = vmul.f32 1.442695, %v452_v51 }
 0x14a   :  { %v172_v54 = vpop.xlane.xlu1 %171  ;;  %v96_v55 = vsel %vm83_vm2, %v454_v52, 0.0 }
 0x14b   :  { %286 = vpow2.f32 %v175_v53  ;;  %v459_v56 = vsub.f32 %v166_v30, %v172_v54  ;;  %97 = vadd.xlane.f32.xlu1 %v96_v55 }
 0x14d   :  { %v461_v57 = vpop.eup %280  ;;  %v177_v58 = vmul.f32 1.442695, %v459_v56 }
 0x14e   :  { %v211_v59 = vpop.xlane.xlu1 %210  ;;  %v99_v60 = vsel %vm83_vm2, %v461_v57, 0.0  ;;  %v283_v61 = vpop.eup %282 }
 0x14f   :  { %288 = vpow2.f32 %v177_v58  ;;  %v466_v62 = vsub.f32 %v207_v33, %v211_v59  ;;  %100 = vadd.xlane.f32.xlu1 %v99_v60  ;;  %v136_v3 = vsel %vm83_vm2, %v283_v61, 0.0 }
 0x151   :  { %v285_v63 = vpop.eup %284  ;;  %v217_v0 = vmul.f32 1.442695, %v466_v62 }
 0x152   :  { %v214_v1 = vpop.xlane.xlu1 %213  ;;  %v139_v2 = vsel %vm83_vm2, %v285_v63, 0.0 }
 0x153   :  { %290 = vpow2.f32 %v217_v0  ;;  %v471_v4 = vsub.f32 %v208_v36, %v214_v1  ;;  %140 = vadd.xlane.f32.xlu0 %v139_v2  ;;  %137 = vadd.xlane.f32.xlu1 %v136_v3 }
 0x155   :  { %v287_v7 = vpop.eup %286  ;;  %v219_v8 = vmul.f32 1.442695, %v471_v4 }
 0x156   :  { %v179_v9 = vsel %vm83_vm2, %v287_v7, 0.0 }
 0x157   :  { %292 = vpow2.f32 %v219_v8  ;;  %180 = vadd.xlane.f32.xlu1 %v179_v9 }
 0x159   :  { %v289_v10 = vpop.eup %288 }
 0x15a   :  { %v182_v11 = vsel %vm83_vm2, %v289_v10, 0.0 }
 0x15b   :  { %183 = vadd.xlane.f32.xlu0 %v182_v11 }
 0x15d   :  { %v291_v12 = vpop.eup %290 }
 0x15e   :  { %v221_v13 = vsel %vm83_vm2, %v291_v12, 0.0 }
 0x15f   :  { %222 = vadd.xlane.f32.xlu1 %v221_v13 }
 0x161   :  { %v293_v14 = vpop.eup %292 }
 0x162   :  { %v224_v15 = vsel %vm83_vm2, %v293_v14, 0.0 }
 0x163   :  { %225 = vadd.xlane.f32.xlu0 %v224_v15 }
 0x1d8   :  { %v98_v16 = vpop.xlane.xlu1 %97 }
 0x1d9   :  { %294 = vrcp.f32 %v98_v16 }
 0x1dc   :  { %v101_v17 = vpop.xlane.xlu1 %100 }
 0x1dd   :  { %296 = vrcp.f32 %v101_v17 }
 0x1e0   :  { %v138_v22 = vpop.xlane.xlu1 %137  ;;  %v141_v23 = vpop.xlane.xlu0 %140 }
 0x1e1   :  { %298 = vlog2.f32 %v138_v22 }
 0x1e2   :  { %300 = vlog2.f32 %v141_v23 }
 0x1e3   :  { %v295_v18 = vpop.eup %294 }
 0x1e4   :  { %v103_v19 = vmul.f32 %v295_v18, %v420_v5  ;;  %v181_v24 = vpop.xlane.xlu1 %180 }
 0x1e5   :  { %302 = vlog2.f32 %v181_v24 }
 0x1e6   :  { %108 = vperm.xlu1 %277, %v103_v19  }
 0x1e7   :  { %v297_v20 = vpop.eup %296 }
 0x1e8   :  { %v105_v21 = vmul.f32 %v297_v20, %v422_v6  ;;  %v184_v25 = vpop.xlane.xlu0 %183 }
 0x1ea   :  { %113 = vperm.xlu0 %276, %v105_v21  }
 0x1eb   :  { %v299_v28 = vpop.eup %298 }
 0x1ec   :  { %v223_v26 = vpop.xlane.xlu1 %222  ;;  %v301_v29 = vpop.eup %300  ;;  %v143_v6 = vmul.f32 0.6931472, %v299_v28 }
 0x1ed   :  { %304 = vlog2.f32 %v223_v26  ;;  %v145_v35 = vmul.f32 0.6931472, %v301_v29 }
 0x1ee   :  { %306 = vlog2.f32 %v184_v25  ;;  %v146_v40 = vsub.f32 %v143_v6, %v446_v42 }
 0x1ef   :  { %v303_v5 = vpop.eup %302  ;;  %v147_v44 = vsub.f32 %v145_v35, %v449_v48 }
 0x1f0   :  { %v226_v27 = vpop.xlane.xlu0 %225  ;;  %v186_v33 = vmul.f32 0.6931472, %v303_v5 }
 0x1f1   :  { %308 = vlog2.f32 %v226_v27 }
 0x1f2   :  { %v189_v41 = vsub.f32 %v186_v33, %v452_v51 }
 0x1f7   :  { %v305_v30 = vpop.eup %304 }
 0x1f8   :  { %v307_v31 = vpop.eup %306  ;;  %v228_v34 = vmul.f32 0.6931472, %v305_v30 }
 0x1f9   :  { %v188_v37 = vmul.f32 0.6931472, %v307_v31 }
 0x1fa   :  { %v231_v43 = vsub.f32 %v228_v34, %v466_v62 }
 0x1fb   :  { %v309_v32 = vpop.eup %308  ;;  %v190_v49 = vsub.f32 %v188_v37, %v459_v56 }
 0x1fc   :  { %v230_v38 = vmul.f32 0.6931472, %v309_v32 }
 0x1fe   :  { %v232_v50 = vsub.f32 %v230_v38, %v471_v4 }
 0x265   :  { %v109_v36 = vpop.permute.xlu1 %108 }
 0x266   :  { %v116_v39 = vmul.f32 %v454_v52, %v109_v36 }
 0x268   :  { %v148_v45 = vmul.f32 %v146_v40, %v116_v39  ;;  %v191_v46 = vmul.f32 %v189_v41, %v116_v39  ;;  %v233_v53 = vmul.f32 %v231_v43, %v116_v39 }
 0x269   :  { %v114_v47 = vpop.permute.xlu0 %113 }
 0x26a   :  { %v117_v54 = vmul.f32 %v461_v57, %v114_v47  ;;  %v150_v42 = vsel %vm83_vm2, %v148_v45, 0.0  ;;  %v193_v51 = vsel %vm83_vm2, %v191_v46, 0.0  ;;  %v235_v59 = vsel %vm83_vm2, %v233_v53, 0.0 }
 0x26c   :  { %v149_v55 = vmul.f32 %v147_v44, %v117_v54  ;;  %v192_v52 = vmul.f32 %v190_v49, %v117_v54  ;;  %v234_v58 = vmul.f32 %v232_v50, %v117_v54 }
 0x26e   :  { %v151_v48 = vsel %vm83_vm2, %v149_v55, 0.0  ;;  %v194_v60 = vsel %vm83_vm2, %v192_v52, 0.0  ;;  %v236_v56 = vsel %vm83_vm2, %v234_v58, 0.0 }
 0x26f   :  { %v152_v61 = vadd.f32 %v151_v48, %v150_v42  ;;  %v195_v62 = vadd.f32 %v194_v60, %v193_v51  ;;  %v237_v63 = vadd.f32 %v236_v56, %v235_v59 }
 0x271   :  { %v153_v0 = vrot.slane %v152_v61, 4  ;;  %v196_v57 = vrot.slane %v195_v62, 4  ;;  %v238_v1 = vrot.slane %v237_v63, 4 }
 0x273   :  { %v154_v2 = vadd.f32 %v153_v0, %v152_v61  ;;  %v197_v3 = vadd.f32 %v196_v57, %v195_v62  ;;  %v239_v4 = vadd.f32 %v238_v1, %v237_v63 }
 0x275   :  { %v155_v7 = vrot.slane %v154_v2, 2  ;;  %v198_v8 = vrot.slane %v197_v3, 2  ;;  %v240_v9 = vrot.slane %v239_v4, 2 }
 0x277   :  { %v156_v10 = vadd.f32 %v155_v7, %v154_v2  ;;  %v199_v11 = vadd.f32 %v198_v8, %v197_v3  ;;  %v241_v12 = vadd.f32 %v240_v9, %v239_v4 }
 0x279   :  { %v157_v13 = vrot.slane %v156_v10, 1  ;;  %v200_v14 = vrot.slane %v199_v11, 1  ;;  %v242_v15 = vrot.slane %v241_v12, 1 }
 0x27b   :  { %v158_v16 = vadd.f32 %v157_v13, %v156_v10  ;;  %v201_v17 = vadd.f32 %v200_v14, %v199_v11  ;;  %v243_v18 = vadd.f32 %v242_v15, %v241_v12 }
 0x27d   :  { %160 = vst.msk [vmem:[%s508_s5] sm:$0x1] %vm159_vm5, %v158_v16  ;;  %202 = vst.msk [vmem:[%s508_s5 + $0x1] sm:$0x1] %vm159_vm5, %v201_v17 }
 0x27e   :  { %244 = vst.msk [vmem:[%s508_s5 + $0x2] sm:$0x1] %vm159_vm5, %v243_v18 }
 0x27f   :  { %249 = vsyncpa [#allocation3], 1 }
 0x280   :  { %250 = vsyncpa [#allocation5], 1 }

</bundles_post_ra>
